<compile_context>
chip_gen: v6e
topology: v6e:2x2x1
jax: 0.10.0
libtpu: 0.0.40
codegen_flags: <defaults>
</compile_context>

<pallas_src>
import functools

import jax
import jax.numpy as jnp
from jax import lax
from jax.experimental import pallas as pl
from jax.experimental.pallas import tpu as pltpu


def _round_up(x, m):
    return ((x + m - 1) // m) * m


def _cdiv(a, b):
    return -(-a // b)


def _gram_kernel(f_ref, o_ref):
    # f_ref: (c_pad, k_tile)  feature block (all channels) for batch b, K tile k
    # o_ref: (tr, c_pad)      f32 Gram row-block; resident across the K axis
    tr, c_pad = o_ref.shape
    i = pl.program_id(1)
    k = pl.program_id(2)

    @pl.when(k == 0)
    def _():
        o_ref[...] = jnp.zeros_like(o_ref)

    f = f_ref[...]
    if tr == c_pad:
        lhs = f                                # single row block: reuse block as-is
    else:
        r0 = pl.multiple_of(i * tr, 128)       # LHS rows = slice of the same block
        lhs = f_ref[pl.ds(r0, tr), :]

    # G_rows += F_rows @ F^T, no explicit transpose (contract last dims → MXU).
    o_ref[...] += lax.dot_general(
        lhs, f,
        dimension_numbers=(((1,), (1,)), ((), ())),
        preferred_element_type=jnp.float32,
    )


@functools.partial(jax.jit, static_argnames=("k_tile", "use_bf16"))
def gram_matrix(x, *, k_tile=2048, use_bf16=True):
    """x: (B, C, H, W) -> (B, C, C), matching torch.bmm(f, f.transpose(1, 2)).

    use_bf16: cast MXU operands to bf16 (accumulation stays f32).  Standard TPU
              precision tradeoff; set False for bit-closer f32 math.
    """
    B, C, H, W = x.shape
    HW = H * W
    feats = x.reshape(B, C, HW)

    compute_dtype = (
        jnp.bfloat16 if (use_bf16 and jnp.issubdtype(x.dtype, jnp.floating))
        else x.dtype
    )
    feats = feats.astype(compute_dtype)
    in_isz = jnp.dtype(compute_dtype).itemsize

    # Channel padding: lane-dense, MXU-aligned.  Zeros do not change F @ F^T.
    c_pad = _round_up(max(C, 1), 128)

    # Output row tile.  tr == c_pad gives the single-pass resident-G layout
    # (features read exactly once).  Split rows only when needed for VMEM
    # (very large C) or to feed both v7x TensorCores when B == 1.
    if c_pad <= 1024:
        tr = c_pad
        if B == 1 and c_pad >= 512 and (c_pad // 2) % 128 == 0:
            tr = c_pad // 2
    else:
        tr = next(t for t in (1024, 512, 256, 128) if c_pad % t == 0)
    n_row_blocks = c_pad // tr

    # K tile: fit a conservative cross-generation VMEM budget, then shrink the
    # tile so HW zero-padding is < 128 lanes per tile (not a whole k_tile).
    budget = 28 * 1024 * 1024                      # double-buffered working set
    out_db = 2 * tr * c_pad * 4                    # f32 output double buffer
    kt_cap = (budget - out_db) // (2 * c_pad * in_isz)
    kt_cap = max(128, (kt_cap // 128) * 128)
    k_tile_max = max(128, min(k_tile, kt_cap))

    hw128 = _round_up(max(HW, 1), 128)
    nkb = _cdiv(hw128, k_tile_max)
    k_tile_eff = _round_up(_cdiv(hw128, nkb), 128)
    hw_pad = k_tile_eff * nkb

    if c_pad != C or hw_pad != HW:
        feats = jnp.pad(feats, ((0, 0), (0, c_pad - C), (0, hw_pad - HW)))

    grid = (B, n_row_blocks, nkb)

    work_set = 2 * c_pad * k_tile_eff * in_isz + out_db
    vmem_limit = min(max(work_set + (4 << 20), 32 << 20), 64 << 20)

    cost = pl.CostEstimate(
        flops=2 * B * c_pad * c_pad * hw_pad,
        transcendentals=0,
        bytes_accessed=B * (n_row_blocks * c_pad * hw_pad * in_isz
                            + c_pad * c_pad * 4),
    )

    out_f32 = pl.pallas_call(
        _gram_kernel,
        out_shape=jax.ShapeDtypeStruct((B, c_pad, c_pad), jnp.float32),
        grid_spec=pltpu.PrefetchScalarGridSpec(
            num_scalar_prefetch=0,
            grid=grid,
            in_specs=[
                # Single feature stream: all channels for K tile k of batch b.
                pl.BlockSpec(
                    (pl.Squeezed(), c_pad, k_tile_eff),
                    lambda b, i, k: (b, 0, k),
                ),
            ],
            out_specs=pl.BlockSpec(
                (pl.Squeezed(), tr, c_pad),
                lambda b, i, k: (b, i, 0),
            ),
        ),
        compiler_params=pltpu.CompilerParams(
            dimension_semantics=("parallel", "parallel", "arbitrary"),
            vmem_limit_bytes=vmem_limit,
        ),
        cost_estimate=cost,
    )(feats)

    return out_f32[:, :C, :C].astype(x.dtype)


if __name__ == "__main__":
    key = jax.random.PRNGKey(0)
    B, C, H, W = 2, 4, 16, 16
    x = jax.random.normal(key, (B, C, H, W), dtype=jnp.float32)

    out = gram_matrix(x)
    out = jax.block_until_ready(out)
    assert out.shape == (B, C, C)
    assert out.dtype == x.dtype

    feats = x.reshape(B, C, H * W)
    ref_f32 = jnp.einsum("bck,bdk->bcd", feats, feats)
    fb = feats.astype(jnp.bfloat16)
    ref_bf16 = jnp.einsum("bck,bdk->bcd", fb, fb,
                          preferred_element_type=jnp.float32)

    # Tight check against a reference using the same bf16-operand / f32-acc math.
    assert jnp.allclose(out, ref_bf16, rtol=1e-3, atol=5e-2)
    # Loose check against the full-f32 reference (bf16 operand quantization).
    assert jnp.allclose(out, ref_f32, rtol=3e-2, atol=1.0)

    print("KERNEL_OK")
</pallas_src>

<mosaic_0001>
module attributes {stable_mosaic.version = 11 : i64} {
  func.func @_gram_kernel(%arg0: i32, %arg1: i32, %arg2: i32, %arg3: memref<1x128x256xbf16, #tpu.memory_space<vmem>>, %arg4: memref<1x128x128xf32, #tpu.memory_space<vmem>>) attributes {dimension_semantics = [#tpu.dimension_semantics<parallel>, #tpu.dimension_semantics<parallel>, #tpu.dimension_semantics<arbitrary>], iteration_bounds = array<i64: 2, 1, 1>, scalar_prefetch = 0 : i64, scratch_operands = 0 : i64, tpu.core_type = #tpu.core_type<tc>, window_params = [{transform_indices = @transform_0, window_bounds = array<i64: 1, 128, 256>}, {transform_indices = @transform_1, window_bounds = array<i64: 1, 128, 128>}]} {
    %c0_i32 = arith.constant 0 : i32
    %0 = arith.cmpi eq, %arg2, %c0_i32 : i32
    %1 = arith.extui %0 : i1 to i32
    %c0_i32_0 = arith.constant 0 : i32
    %2 = arith.cmpi ne, %1, %c0_i32_0 : i32
    scf.if %2 {
      %cst_9 = arith.constant 0.000000e+00 : f32
      %12 = vector.broadcast %cst_9 : f32 to vector<128x128xf32>
      %c0_10 = arith.constant 0 : index
      %c0_11 = arith.constant 0 : index
      %c0_12 = arith.constant 0 : index
      %13 = vector.load %arg4[%c0_10, %c0_11, %c0_12] : memref<1x128x128xf32, #tpu.memory_space<vmem>>, vector<1x128x128xf32>
      %14 = vector.shape_cast %13 : vector<1x128x128xf32> to vector<128x128xf32>
      %15 = vector.shape_cast %12 : vector<128x128xf32> to vector<1x128x128xf32>
      tpu.vector_store %arg4[%c0_10, %c0_11, %c0_12], %15 {strides = array<i32>} : memref<1x128x128xf32, #tpu.memory_space<vmem>>, vector<1x128x128xf32>,
    } else {
    }
    %c0 = arith.constant 0 : index
    %c0_1 = arith.constant 0 : index
    %c0_2 = arith.constant 0 : index
    %3 = vector.load %arg3[%c0, %c0_1, %c0_2] : memref<1x128x256xbf16, #tpu.memory_space<vmem>>, vector<1x128x256xbf16>
    %4 = vector.shape_cast %3 : vector<1x128x256xbf16> to vector<128x256xbf16>
    %c0_3 = arith.constant 0 : index
    %c0_4 = arith.constant 0 : index
    %c0_5 = arith.constant 0 : index
    %5 = vector.load %arg4[%c0_3, %c0_4, %c0_5] : memref<1x128x128xf32, #tpu.memory_space<vmem>>, vector<1x128x128xf32>
    %6 = vector.shape_cast %5 : vector<1x128x128xf32> to vector<128x128xf32>
    %cst = arith.constant dense<0.000000e+00> : vector<128x128xf32>
    %7 = tpu.matmul %4, %4, %cst {dimension_numbers = #tpu.dot_dimension_numbers<[1], [1], [0], [0], [0, 0, 1, 0], [], []>} : vector<128x256xbf16>, vector<128x256xbf16>, vector<128x128xf32> -> vector<128x128xf32>
    %8 = arith.addf %6, %7 : vector<128x128xf32>
    %c0_6 = arith.constant 0 : index
    %c0_7 = arith.constant 0 : index
    %c0_8 = arith.constant 0 : index
    %9 = vector.load %arg4[%c0_6, %c0_7, %c0_8] : memref<1x128x128xf32, #tpu.memory_space<vmem>>, vector<1x128x128xf32>
    %10 = vector.shape_cast %9 : vector<1x128x128xf32> to vector<128x128xf32>
    %11 = vector.shape_cast %8 : vector<128x128xf32> to vector<1x128x128xf32>
    tpu.vector_store %arg4[%c0_6, %c0_7, %c0_8], %11 {strides = array<i32>} : memref<1x128x128xf32, #tpu.memory_space<vmem>>, vector<1x128x128xf32>,
    return
  }
  func.func @transform_0(%arg0: i32, %arg1: i32, %arg2: i32) -> (i32, i32, i32) {
    %c0_i32 = arith.constant 0 : i32
    %c0_i32_0 = arith.constant 0 : i32
    return %arg0, %c0_i32, %arg2 : i32, i32, i32
  }
  func.func @transform_1(%arg0: i32, %arg1: i32, %arg2: i32) -> (i32, i32, i32) {
    %c0_i32 = arith.constant 0 : i32
    %c0_i32_0 = arith.constant 0 : i32
    return %arg0, %arg1, %c0_i32 : i32, i32, i32
  }
}

</mosaic_0001>

<bundles_post_ra>
// kernel: gram_matrix.1
= control target key start
LH: loop header
LB: loop body
LE: loop exit
PB: predicated region body
PF: predicated region fallthrough
CT: control target
= control target key end

     0   :  { %s643_s6 = smov 0   ;;  %s645_s7 = smov 0   ;;  %s719_s0 = inlined_call_operand.vmem [shape: bf16[2,128,256], index: 0, kind: input, shape index: {}]   ;;  %s720_s1 = inlined_call_operand.vmem [shape: f32[2,128,128], index: 1, kind: output, shape index: {}]  }
   0x1   :  { %s647_s8 = smov 0  }
   0x2 LB: > { %s30_s9 = sadd.s32 1, %s627_s7  ;;  %p519_p0 = scmp.ge.s32.totalorder %s631_s8, 1  ;;  %s631_s8 = sphi %s647_s8, %s11_s8   ;;  %s627_s7 = sphi %s645_s7, %s722_s7   ;;  %s623_s6 = sphi %s643_s6, %s721_s6  }
   0x3   : > { %p32_p1 = scmp.ge.s32.totalorder %s30_s9, 2  ;;  %p115_p2 = scmp.lt.s32.totalorder %s631_s8, 3 }
   0x5   : > { %s724_s9 = smov (%p32_p1, %s30_s9), 0  ;;  %p116_p3 = pnand %p519_p0, %p115_p2 }
   0x6   : > { %p144_p4 = scmp.lt.s32.totalorder (!%p116_p3), %s623_s6, 1 }
   0x7   : > { %119 = sbr.rel (%p116_p3) target bundleno = 303 (0x12f), region = 24 }
   0xc   : > { %s726_s6 = smov (!%p144_p4, %s623_s6), 1 }
   0xd   : > { %s542_s10 = sshll.u32 %s726_s6, 7 }
   0xe   : > { %s669_s13 = scalar_lea.vmem %s719_s0, %s542_s10  ;;  %s692_s16 = scalar_lea.vmem %s720_s1, %s542_s10 }
   0xf   : > { %v585_v0 = vld [vmem:[%s669_s13 + $0x74] ss:$8 sps:$4 sm:$0xff]   ;;  %v587_v1 = vld [vmem:[%s669_s13 + $0x70] ss:$8 sps:$4 sm:$0xff]   ;;  %v588_v2 = vld [vmem:[%s669_s13 + $0x64] ss:$8 sps:$4 sm:$0xff]  }
  0x10   : > { %296 = vmatprep.subr.bf16.mxu0 %v585_v0  ;;  %544 = vmatprep.subr.bf16.mxu1 %v585_v0  ;;  %v594_v3 = vld [vmem:[%s669_s13 + $0x44] ss:$8 sps:$4 sm:$0xff]   ;;  %v590_v4 = vld [vmem:[%s669_s13 + $0x60] ss:$8 sps:$4 sm:$0xff]   ;;  %v591_v5 = vld [vmem:[%s669_s13 + $0x54] ss:$8 sps:$4 sm:$0xff]  }
  0x11   : > { %297 = vmatpush1.bf16.xpose.msra.mxu0 %v587_v1  ;;  %552 = vmatpush1.bf16.xpose.msra.mxu1 %v587_v1  ;;  %v606_v6 = vld [vmem:[%s669_s13 + $0x4] ss:$8 sps:$4 sm:$0xff]   ;;  %v593_v7 = vld [vmem:[%s669_s13 + $0x50] ss:$8 sps:$4 sm:$0xff]   ;;  %v596_v8 = vld [vmem:[%s669_s13 + $0x40] ss:$8 sps:$4 sm:$0xff]  }
  0x12   : > { %298 = vmatprep.subr.bf16.mxu0 %v588_v2  ;;  %545 = vmatprep.subr.bf16.mxu1 %v588_v2  ;;  %v597_v9 = vld [vmem:[%s669_s13 + $0x34] ss:$8 sps:$4 sm:$0xff]   ;;  %v599_v10 = vld [vmem:[%s669_s13 + $0x30] ss:$8 sps:$4 sm:$0xff]   ;;  %v600_v11 = vld [vmem:[%s669_s13 + $0x24] ss:$8 sps:$4 sm:$0xff]  }
  0x13   : > { %360 = vmatprep.mubr.bf16.mxu1 %v594_v3  ;;  %328 = vmatprep.mubr.bf16.mxu0 %v606_v6  ;;  %v602_v12 = vld [vmem:[%s669_s13 + $0x20] ss:$8 sps:$4 sm:$0xff]   ;;  %v603_v13 = vld [vmem:[%s669_s13 + $0x14] ss:$8 sps:$4 sm:$0xff]   ;;  %v605_v14 = vld [vmem:[%s669_s13 + $0x10] ss:$8 sps:$4 sm:$0xff]  }
  0x14   : > { %v608_v15 = vld [vmem:[%s669_s13] ss:$8 sps:$4 sm:$0xff]  }
  0x19   : > { %299 = vmatpush1.bf16.xpose.msra.mxu0 %v590_v4  ;;  %553 = vmatpush1.bf16.xpose.msra.mxu1 %v590_v4 }
  0x1a   : > { %300 = vmatprep.subr.bf16.mxu0 %v591_v5  ;;  %546 = vmatprep.subr.bf16.mxu1 %v591_v5 }
  0x21   : > { %301 = vmatpush1.bf16.xpose.msra.mxu0 %v593_v7  ;;  %554 = vmatpush1.bf16.xpose.msra.mxu1 %v593_v7 }
  0x22   : > { %302 = vmatprep.subr.bf16.mxu0 %v594_v3  ;;  %547 = vmatprep.subr.bf16.mxu1 %v594_v3 }
  0x29   : > { %303 = vmatpush1.bf16.xpose.msra.mxu0 %v596_v8  ;;  %555 = vmatpush1.bf16.xpose.msra.mxu1 %v596_v8 }
  0x2a   : > { %304 = vmatprep.subr.bf16.mxu0 %v597_v9  ;;  %548 = vmatprep.subr.bf16.mxu1 %v597_v9 }
  0x31   : > { %305 = vmatpush1.bf16.xpose.msra.mxu0 %v599_v10  ;;  %556 = vmatpush1.bf16.xpose.msra.mxu1 %v599_v10 }
  0x32   : > { %306 = vmatprep.subr.bf16.mxu0 %v600_v11  ;;  %549 = vmatprep.subr.bf16.mxu1 %v600_v11 }
  0x39   : > { %307 = vmatpush1.bf16.xpose.msra.mxu0 %v602_v12  ;;  %557 = vmatpush1.bf16.xpose.msra.mxu1 %v602_v12 }
  0x3a   : > { %308 = vmatprep.subr.bf16.mxu0 %v603_v13  ;;  %550 = vmatprep.subr.bf16.mxu1 %v603_v13 }
  0x41   : > { %309 = vmatpush1.bf16.xpose.msra.mxu0 %v605_v14  ;;  %558 = vmatpush1.bf16.xpose.msra.mxu1 %v605_v14 }
  0x42   : > { %310 = vmatprep.subr.bf16.mxu0 %v606_v6  ;;  %551 = vmatprep.subr.bf16.mxu1 %v606_v6 }
  0x49   : > { %311 = vmatpush1.bf16.xpose.msra.mxu0 %v608_v15  ;;  %559 = vmatpush1.bf16.xpose.msra.mxu1 %v608_v15 }
  0x50   : > { %329 = vmatmul.mubr.bf16.vlgmr.msra.gmra.mxu0 %v608_v15  ;;  %361 = vmatmul.mubr.bf16.vlgmr.msra.gmra.mxu1 %v596_v8 }
  0x51   : > { %336 = vmatprep.mubr.bf16.mxu0 %v603_v13  ;;  %368 = vmatprep.mubr.bf16.mxu1 %v591_v5 }
  0x58   : > { %337 = vmatmul.mubr.bf16.gmra.mxu0 %v605_v14  ;;  %369 = vmatmul.mubr.bf16.gmra.mxu1 %v593_v7 }
  0x59   : > { %344 = vmatprep.mubr.bf16.mxu0 %v600_v11  ;;  %376 = vmatprep.mubr.bf16.mxu1 %v588_v2 }
  0x60   : > { %345 = vmatmul.mubr.bf16.gmra.mxu0 %v602_v12  ;;  %377 = vmatmul.mubr.bf16.gmra.mxu1 %v590_v4 }
  0x61   : > { %352 = vmatprep.mubr.bf16.mxu0 %v597_v9  ;;  %384 = vmatprep.mubr.bf16.mxu1 %v585_v0 }
  0x68   : > { %353 = vmatmul.mubr.bf16.gmra.mxu0 %v599_v10  ;;  %385 = vmatmul.mubr.bf16.gmra.mxu1 %v587_v1 }
 0x110   : > { %v330_v16 = vpop.f32.mrf.mxu0  ;;  %v362_v17 = vpop.f32.mrf.mxu1 }
 0x111   : > { %409 = vst [vmem:[%s692_s16] sm:$0xff] %v330_v16  ;;  %417 = vst [vmem:[%s692_s16 + $0x40] sm:$0xff] %v362_v17 }
 0x112   : > { %v332_v18 = vpop.f32.mrf.mxu0  ;;  %v364_v19 = vpop.f32.mrf.mxu1 }
 0x114   : > { %v333_v20 = vpop.f32.mrf.mxu0  ;;  %v365_v21 = vpop.f32.mrf.mxu1 }
 0x115   : > { %410 = vst [vmem:[%s692_s16 + $0x8] sm:$0xff] %v333_v20  ;;  %418 = vst [vmem:[%s692_s16 + $0x48] sm:$0xff] %v365_v21 }
 0x116   : > { %v335_v22 = vpop.f32.mrf.mxu0  ;;  %v367_v23 = vpop.f32.mrf.mxu1 }
 0x118   : > { %v338_v24 = vpop.f32.mrf.mxu0  ;;  %v370_v25 = vpop.f32.mrf.mxu1 }
 0x119   : > { %411 = vst [vmem:[%s692_s16 + $0x10] sm:$0xff] %v338_v24  ;;  %419 = vst [vmem:[%s692_s16 + $0x50] sm:$0xff] %v370_v25 }
 0x11a   : > { %v340_v26 = vpop.f32.mrf.mxu0  ;;  %v372_v27 = vpop.f32.mrf.mxu1 }
 0x11c   : > { %v341_v28 = vpop.f32.mrf.mxu0  ;;  %v373_v29 = vpop.f32.mrf.mxu1 }
 0x11d   : > { %412 = vst [vmem:[%s692_s16 + $0x18] sm:$0xff] %v341_v28  ;;  %420 = vst [vmem:[%s692_s16 + $0x58] sm:$0xff] %v373_v29 }
 0x11e   : > { %v343_v30 = vpop.f32.mrf.mxu0  ;;  %v375_v31 = vpop.f32.mrf.mxu1 }
 0x120   : > { %v346_v32 = vpop.f32.mrf.mxu0  ;;  %v378_v33 = vpop.f32.mrf.mxu1 }
 0x121   : > { %413 = vst [vmem:[%s692_s16 + $0x20] sm:$0xff] %v346_v32  ;;  %421 = vst [vmem:[%s692_s16 + $0x60] sm:$0xff] %v378_v33 }
 0x122   : > { %v348_v34 = vpop.f32.mrf.mxu0  ;;  %v380_v35 = vpop.f32.mrf.mxu1 }
 0x124   : > { %v349_v36 = vpop.f32.mrf.mxu0  ;;  %v381_v37 = vpop.f32.mrf.mxu1 }
 0x125   : > { %414 = vst [vmem:[%s692_s16 + $0x28] sm:$0xff] %v349_v36  ;;  %422 = vst [vmem:[%s692_s16 + $0x68] sm:$0xff] %v381_v37 }
 0x126   : > { %v351_v38 = vpop.f32.mrf.mxu0  ;;  %v383_v39 = vpop.f32.mrf.mxu1 }
 0x128   : > { %v354_v40 = vpop.f32.mrf.mxu0  ;;  %v386_v41 = vpop.f32.mrf.mxu1 }
 0x129   : > { %415 = vst [vmem:[%s692_s16 + $0x30] sm:$0xff] %v354_v40  ;;  %423 = vst [vmem:[%s692_s16 + $0x70] sm:$0xff] %v386_v41 }
 0x12a   : > { %v356_v42 = vpop.f32.mrf.mxu0  ;;  %v388_v43 = vpop.f32.mrf.mxu1 }
 0x12c   : > { %v357_v44 = vpop.f32.mrf.mxu0  ;;  %v389_v45 = vpop.f32.mrf.mxu1 }
 0x12d   : > { %416 = vst [vmem:[%s692_s16 + $0x38] sm:$0xff] %v357_v44  ;;  %424 = vst [vmem:[%s692_s16 + $0x78] sm:$0xff] %v389_v45 }
 0x12e   : > { %v359_v46 = vpop.f32.mrf.mxu0  ;;  %v391_v47 = vpop.f32.mrf.mxu1 }
 0x12f PF: > { %s11_s8 = sadd.s32 1, %s631_s8   ;;  %s721_s6 = smov %s627_s7 }
 0x130   : > { %p8_p5 = scmp.ge.s32.totalorder %s11_s8, 4   ;;  %s722_s7 = smov %s724_s9 }
 0x132   :  { %10 = sbr.rel (!%p8_p5) target bundleno = 2 (0x2), region = 58 }

</bundles_post_ra>
